<compile_context>
chip_gen: v7x
topology: tpu7x:2x2x1
jax: 0.10.0
libtpu: 0.0.40
codegen_flags: <defaults>
</compile_context>

<pallas_src>
import jax
import jax.numpy as jnp
from jax.experimental import pallas as pl
from jax.experimental.pallas import tpu as pltpu

N, IN_F, OUT_F = 16, 8, 8


def _linear_sub_kernel(x_ref, w_ref, b_ref, noise_ref, o_ref):
    # o = x @ W + b - noise   (bias broadcast (1, OUT_F) -> (N, OUT_F))
    o_ref[...] = (
        jnp.dot(
            x_ref[...],
            w_ref[...],
            preferred_element_type=jnp.float32,
            precision=jax.lax.Precision.HIGHEST,
        )
        + b_ref[...]
        - noise_ref[...]
    )


@jax.jit
def linear_sub(x, w, b2d, noise):
    flops = 2 * N * IN_F * OUT_F + 2 * N * OUT_F
    bytes_accessed = 4 * (N * IN_F + IN_F * OUT_F + OUT_F + N * OUT_F + N * OUT_F)
    return pl.pallas_call(
        _linear_sub_kernel,
        out_shape=jax.ShapeDtypeStruct((N, OUT_F), jnp.float32),
        in_specs=[
            pl.BlockSpec(memory_space=pltpu.VMEM),  # x      (N, IN_F)
            pl.BlockSpec(memory_space=pltpu.VMEM),  # W      (IN_F, OUT_F)
            pl.BlockSpec(memory_space=pltpu.VMEM),  # b      (1, OUT_F)
            pl.BlockSpec(memory_space=pltpu.VMEM),  # noise  (N, OUT_F)
        ],
        out_specs=pl.BlockSpec(memory_space=pltpu.VMEM),
        cost_estimate=pl.CostEstimate(
            flops=flops, bytes_accessed=bytes_accessed, transcendentals=0
        ),
    )(x, w, b2d, noise)


if __name__ == "__main__":
    key = jax.random.PRNGKey(0)
    k_x, k_w, k_b, k_noise = jax.random.split(key, 4)

    # Input x3 ~ randn(16, 8)
    x3 = jax.random.normal(k_x, (N, IN_F), dtype=jnp.float32)

    # Deterministic "Linear(8, 8)" parameters (kaiming-uniform-ish like torch).
    bound = 1.0 / jnp.sqrt(IN_F)
    w_t = jax.random.uniform(
        k_w, (OUT_F, IN_F), minval=-bound, maxval=bound, dtype=jnp.float32
    )  # torch stores (out, in)
    w = w_t.T  # kernel uses (in, out): x @ W
    b = jax.random.uniform(
        k_b, (OUT_F,), minval=-bound, maxval=bound, dtype=jnp.float32
    )
    b2d = b.reshape(1, OUT_F)  # 2-D for a clean (sublane, lane) VMEM layout

    # v40 = torch.randn(16, 8) generated in forward — deterministic stand-in.
    v40 = jax.random.normal(k_noise, (N, OUT_F), dtype=jnp.float32)

    out = linear_sub(x3, w, b2d, v40)
    jax.block_until_ready(out)

    # Reference in plain JAX (matches torch semantics: Linear(x) - noise).
    ref = (
        jnp.dot(x3, w, precision=jax.lax.Precision.HIGHEST)
        + b[None, :]
        - v40
    )
    assert jnp.allclose(out, ref, atol=1e-5, rtol=1e-5), "mismatch vs reference"

    print("KERNEL_OK")
</pallas_src>

<mosaic_0001>
module attributes {stable_mosaic.version = 11 : i64} {
  func.func @_linear_sub_kernel(%arg0: memref<16x8xf32, #tpu.memory_space<vmem>>, %arg1: memref<8x8xf32, #tpu.memory_space<vmem>>, %arg2: memref<1x8xf32, #tpu.memory_space<vmem>>, %arg3: memref<16x8xf32, #tpu.memory_space<vmem>>, %arg4: memref<16x8xf32, #tpu.memory_space<vmem>>) attributes {dimension_semantics = [], scalar_prefetch = 0 : i64, scratch_operands = 0 : i64, tpu.core_type = #tpu.core_type<tc>} {
    %c0 = arith.constant 0 : index
    %c0_0 = arith.constant 0 : index
    %0 = vector.load %arg0[%c0, %c0_0] : memref<16x8xf32, #tpu.memory_space<vmem>>, vector<16x8xf32>
    %c0_1 = arith.constant 0 : index
    %c0_2 = arith.constant 0 : index
    %1 = vector.load %arg1[%c0_1, %c0_2] : memref<8x8xf32, #tpu.memory_space<vmem>>, vector<8x8xf32>
    %cst = arith.constant dense<0.000000e+00> : vector<16x8xf32>
    %2 = tpu.matmul %0, %1, %cst {dimension_numbers = #tpu.dot_dimension_numbers<[1], [0], [0], [1], [0, 0, 1, 1], [], []>, precision = #tpu.contract_precision<fp32>} : vector<16x8xf32>, vector<8x8xf32>, vector<16x8xf32> -> vector<16x8xf32>
    %c0_3 = arith.constant 0 : index
    %c0_4 = arith.constant 0 : index
    %3 = vector.load %arg2[%c0_3, %c0_4] : memref<1x8xf32, #tpu.memory_space<vmem>>, vector<1x8xf32>
    %4 = vector.broadcast %3 : vector<1x8xf32> to vector<16x8xf32>
    %5 = arith.addf %2, %4 : vector<16x8xf32>
    %c0_5 = arith.constant 0 : index
    %c0_6 = arith.constant 0 : index
    %6 = vector.load %arg3[%c0_5, %c0_6] : memref<16x8xf32, #tpu.memory_space<vmem>>, vector<16x8xf32>
    %7 = arith.subf %5, %6 : vector<16x8xf32>
    %c0_7 = arith.constant 0 : index
    %c0_8 = arith.constant 0 : index
    %8 = vector.load %arg4[%c0_7, %c0_8] : memref<16x8xf32, #tpu.memory_space<vmem>>, vector<16x8xf32>
    tpu.vector_store %arg4[%c0_7, %c0_8], %7 {strides = array<i32>} : memref<16x8xf32, #tpu.memory_space<vmem>>, vector<16x8xf32>,
    return
  }
}

</mosaic_0001>

<bundles_post_ra>
// kernel: linear_sub.1
= control target key start
LH: loop header
LB: loop body
LE: loop exit
PB: predicated region body
PF: predicated region fallthrough
CT: control target
= control target key end

     0   :  { %vm27_vm0 = vcmask 64512   ;;  %s647_s1 = inlined_call_operand.vmem [shape: f32[8,8], index: 1, kind: input, shape index: {}]   ;;  %s648_s0 = inlined_call_operand.vmem [shape: f32[16,8], index: 0, kind: input, shape index: {}]   ;;  %s649_s2 = inlined_call_operand.vmem [shape: f32[1,8], index: 2, kind: input, shape index: {}]   ;;  %s650_s3 = inlined_call_operand.vmem [shape: f32[16,8], index: 3, kind: input, shape index: {}]   ;;  %s651_s4 = inlined_call_operand.vmem [shape: f32[16,8], index: 4, kind: output, shape index: {}]  }
   0x1   :  { %v19_v0 = vld [vmem:[%s647_s1] sm:$0xff]  ;;  %v18_v2 = vld [vmem:[%s648_s0 + $0x8] sm:$0xff] }
   0x2   :  { %v17_v1 = vld [vmem:[%s648_s0] sm:$0xff]  ;;  %v35_v3 = vand.u32 4294901760, %v19_v0  ;;  %v32_v5 = vsel %vm27_vm0, %v18_v2, 0  ;;  %v524_v26 = vld [vmem:[%s650_s3 + $0x8] sm:$0xff] }
   0x3   :  { %v29_v4 = vsel %vm27_vm0, %v17_v1, 0  ;;  %v110_v7 = vand.u32 4294901760, %v32_v5  ;;  %v533_v22 = vld [vmem:[%s649_s2] ss:$0 sm:$0xff] }
   0x4   :  { %v100_v6 = vand.u32 4294901760, %v29_v4  ;;  %567 = vmatprep.subr.mxu0 %v35_v3  ;;  %552 = vmatprep.subr.mxu1 %v35_v3  ;;  %v122_v8 = vsub.f32 %v19_v0, %v35_v3  ;;  %v523_v29 = vld [vmem:[%s650_s3] sm:$0xff] }
   0x5   :  { %568 = vmatpush3.msra.mxu0 %v35_v3  ;;  %v111_v10 = vsub.f32 %v32_v5, %v110_v7  ;;  %553 = vmatpush3.msra.mxu1 %v35_v3 }
   0x6   :  { %v101_v9 = vsub.f32 %v29_v4, %v100_v6  ;;  %v123_v11 = vand.u32 4294901760, %v122_v8 }
   0x7   :  { %v112_v13 = vand.u32 4294901760, %v111_v10 }
   0x8   :  { %v102_v12 = vand.u32 4294901760, %v101_v9  ;;  %v124_v14 = vsub.f32 %v122_v8, %v123_v11  ;;  %572 = vmatprep.subr.mxu0 %v123_v11 }
   0x9   :  { %v113_v16 = vsub.f32 %v111_v10, %v112_v13 }
   0xa   :  { %569 = vmatprep.mubr.f32.mxu0 %v102_v12  ;;  %v103_v15 = vsub.f32 %v101_v9, %v102_v12  ;;  %v125_v17 = vand.u32 4294901760, %v124_v14 }
   0xb   :  { %570 = vmatmul.mubr.f32.vlgmr.msra.gmra.mrb[0].mxu0 %v112_v13  ;;  %v114_v19 = vand.u32 4294901760, %v113_v16 }
   0xc   :  { %v104_v18 = vand.u32 4294901760, %v103_v15  ;;  %573 = vmatpush3.msra.mxu0 %v123_v11  ;;  %574 = vmatprep.mubr.f32.mxu0 %v100_v6 }
   0xd   :  { %557 = vmatprep.subr.mxu1 %v125_v17  ;;  %577 = vmatprep.subr.mxu0 %v35_v3 }
   0xe   :  { %554 = vmatprep.mubr.f32.mxu1 %v104_v18 }
   0xf   :  { %555 = vmatmul.mubr.f32.vlgmr.msra.gmra.mrb[0].mxu1 %v114_v19 }
  0x10   :  { %558 = vmatpush3.msra.mxu1 %v125_v17  ;;  %559 = vmatprep.mubr.f32.mxu1 %v100_v6 }
  0x11   :  { %562 = vmatprep.subr.mxu1 %v122_v8 }
  0x13   :  { %575 = vmatmul.mubr.f32.vlgmr.msra.gmra.mrb[0].mxu0 %v110_v7 }
  0x14   :  { %578 = vmatpush3.msra.mxu0 %v35_v3  ;;  %579 = vmatprep.mubr.f32.mxu0 %v100_v6 }
  0x17   :  { %560 = vmatmul.mubr.f32.vlgmr.msra.gmra.mrb[0].mxu1 %v110_v7 }
  0x18   :  { %563 = vmatpush3.msra.mxu1 %v122_v8  ;;  %564 = vmatprep.mubr.f32.mxu1 %v101_v9 }
  0x1b   :  { %580 = vmatmul.mubr.f32.vlgmr.msra.gmra.mrb[0].mxu0 %v110_v7 }
  0x1f   :  { %565 = vmatmul.mubr.f32.vlgmr.msra.gmra.mrb[0].mxu1 %v111_v10 }
  0xee   :  { %v581_v20 = vpop.f32.mrb[0].mxu0 }
  0xef   :  { %v513_v21 = vpop.f32.mrb[1].mxu0 }
  0xf2   :  { %v566_v23 = vpop.f32.mrb[0].mxu1 }
  0xf3   :  { %v582_v24 = vadd.f32 %v566_v23, %v533_v22  ;;  %v272_v25 = vpop.f32.mrb[1].mxu1 }
  0xf4   :  { %v584_v27 = vadd.f32 %v533_v22, %v272_v25 }
  0xf5   :  { %v583_v28 = vadd.f32 %v582_v24, %v581_v20 }
  0xf6   :  { %v585_v30 = vadd.f32 %v584_v27, %v513_v21 }
  0xf7   :  { %v526_v31 = vsub.f32 %v583_v28, %v524_v26 }
  0xf8   :  { %v525_v32 = vsub.f32 %v585_v30, %v523_v29 }
  0xf9   :  { %528 = vst.msk [vmem:[%s651_s4 + $0x8] sm:$0xff] %vm27_vm0, %v526_v31 }
  0xfa   :  { %527 = vst.msk [vmem:[%s651_s4] sm:$0xff] %vm27_vm0, %v525_v32 }

</bundles_post_ra>
